<compile_context>
chip_gen: v6e
topology: v6e:2x2x1
jax: 0.10.0
libtpu: 0.0.40
codegen_flags: <defaults>
</compile_context>

<pallas_src>
import functools
import math

import jax
import jax.numpy as jnp
from jax.experimental import pallas as pl
from jax.experimental.pallas import tpu as pltpu


def _round_up(x, m):
    return (x + m - 1) // m * m


def _epilogue_dtype():
    """bf16 bias-add/ReLU only on chips with a bf16 VPU (v6e, v7x)."""
    kind = jax.devices()[0].device_kind.lower()
    if ("v6" in kind) or ("v7" in kind) or ("7x" in kind):
        return jnp.bfloat16
    return jnp.float32


def _critic_kernel(x_ref,
                   w1_ref, b1_ref,
                   w2_ref, b2_ref,
                   w3_ref, b3_ref,
                   w4_ref, b4_ref,
                   out_ref):
    """Fused 4-layer MLP (value head), feature-major layout.

    x_ref  : (IN_PAD, TB) bf16  one batch tile (features on sublanes, batch on lanes)
    w1..w3 : bf16 resident weights in torch (out, in) layout
    b1..b3 : (H, 1) bias columns (bf16 on v6e/v7x, f32 on v5e)
    w4     : (8, H) bf16 (row 0 = fc4 weight, rows 1..7 zero-padding for MXU tiling)
    b4     : (1, 1) f32
    out_ref: (1, TB) f32        lane-dense output row for this batch tile
    """
    def layer(w_ref, b_ref, x_bf16):
        # MXU matmul with f32 accumulation; epilogue in the bias dtype
        # (bf16 on v6e/v7x -> half the VALU traffic, f32 on v5e).
        h = jnp.dot(w_ref[...], x_bf16, preferred_element_type=jnp.float32)
        h = jnp.maximum(h.astype(b_ref.dtype) + b_ref[...], 0.0)
        return h.astype(jnp.bfloat16)

    h = layer(w1_ref, b1_ref, x_ref[...])   # (H, TB)
    # dropout (eval mode) == identity
    h = layer(w2_ref, b2_ref, h)
    # dropout (eval mode) == identity
    h = layer(w3_ref, b3_ref, h)

    # fc4 on the MXU (M padded to 8 sublanes); row 0 carries the real output.
    out = jnp.dot(w4_ref[...], h, preferred_element_type=jnp.float32)   # (8, TB)
    out_ref[...] = (out[0:1, :] + b4_ref[...]).astype(out_ref.dtype)


@functools.partial(jax.jit, static_argnames=("block_batch",))
def critic_forward(state, params, *, block_batch=2048):
    """Eval-mode CriticNetwork forward: (batch, input_size) f32 -> (batch, 1) f32."""
    batch, in_features = state.shape
    hidden = params["w1"].shape[0]
    epi_dtype = _epilogue_dtype()

    # bf16 activations: keep the feature (sublane) dim a multiple of 16.
    in_pad = _round_up(in_features, 16)

    # Batch tile: always a multiple of 128 (lane-dense stores); keep >= 2 grid
    # steps when the batch allows it so the "parallel" axis can shard across
    # v7x's two TensorCores (harmless on single-TC v5e/v6e).
    b128 = _round_up(batch, 128)
    tb = min(_round_up(block_batch, 128), b128)
    half = _round_up(b128 // 2, 128)
    if b128 >= 2 * 128 and tb > half:
        tb = half
    b_pad = _round_up(b128, tb)
    grid = (b_pad // tb,)

    # Feature-major bf16 input: features on sublanes, batch on lanes.  The cast
    # fuses into the pad/transpose producer -> streamed DMA is half the bytes.
    x_t = jnp.pad(state.astype(jnp.bfloat16).T,
                  ((0, in_pad - in_features), (0, b_pad - batch)))

    # bf16 weights for the MXU; biases in the epilogue dtype; b4 stays f32.
    w1 = jnp.pad(params["w1"],
                 ((0, 0), (0, in_pad - in_features))).astype(jnp.bfloat16)   # (H, IN_PAD)
    w2 = params["w2"].astype(jnp.bfloat16)                                   # (H, H)
    w3 = params["w3"].astype(jnp.bfloat16)                                   # (H, H)
    w4 = jnp.pad(params["w4"].reshape(1, hidden),
                 ((0, 7), (0, 0))).astype(jnp.bfloat16)                      # (8, H)
    b1 = params["b1"].reshape(hidden, 1).astype(epi_dtype)
    b2 = params["b2"].reshape(hidden, 1).astype(epi_dtype)
    b3 = params["b3"].reshape(hidden, 1).astype(epi_dtype)
    b4 = params["b4"].reshape(1, 1).astype(jnp.float32)

    def resident(shape):
        # Same block for every grid step -> stays resident in VMEM (no re-DMA).
        return pl.BlockSpec(shape, lambda i: (0, 0))

    operands = (x_t, w1, b1, w2, b2, w3, b3, w4, b4)
    bytes_accessed = (sum(int(a.size) * a.dtype.itemsize for a in operands)
                      + b_pad * 4)
    flops = 2 * b_pad * (in_pad * hidden + 2 * hidden * hidden + 8 * hidden)

    out_row = pl.pallas_call(
        _critic_kernel,
        out_shape=jax.ShapeDtypeStruct((1, b_pad), jnp.float32),
        grid=grid,
        in_specs=[
            pl.BlockSpec((in_pad, tb), lambda i: (0, i)),    # batch-tiled input
            resident((hidden, in_pad)), resident((hidden, 1)),
            resident((hidden, hidden)), resident((hidden, 1)),
            resident((hidden, hidden)), resident((hidden, 1)),
            resident((8, hidden)), resident((1, 1)),
        ],
        out_specs=pl.BlockSpec((1, tb), lambda i: (0, i)),   # lane-dense output row
        compiler_params=pltpu.CompilerParams(
            dimension_semantics=("parallel",),
            vmem_limit_bytes=32 * 1024 * 1024),
        cost_estimate=pl.CostEstimate(flops=flops, transcendentals=0,
                                      bytes_accessed=bytes_accessed),
    )(*operands)

    return out_row[0, :batch][:, None]


def _xavier_uniform(key, out_features, in_features, dtype=jnp.float32):
    # matches torch.nn.init.xavier_uniform_ : U(-a, a), a = sqrt(6/(fan_in+fan_out))
    bound = math.sqrt(6.0 / (in_features + out_features))
    return jax.random.uniform(key, (out_features, in_features), dtype=dtype,
                              minval=-bound, maxval=bound)


def init_params(key, input_size, hidden_size=128):
    # torch-native layout: weight (out_features, in_features), bias (out_features,)
    k1, k2, k3, k4 = jax.random.split(key, 4)
    return {
        "w1": _xavier_uniform(k1, hidden_size, input_size),
        "b1": jnp.zeros((hidden_size,), jnp.float32),
        "w2": _xavier_uniform(k2, hidden_size, hidden_size),
        "b2": jnp.zeros((hidden_size,), jnp.float32),
        "w3": _xavier_uniform(k3, hidden_size, hidden_size),
        "b3": jnp.zeros((hidden_size,), jnp.float32),
        "w4": _xavier_uniform(k4, 1, hidden_size),
        "b4": jnp.zeros((1,), jnp.float32),
    }


def _reference_forward(state, params):
    """Plain-JAX f32 reference (eval-mode dropout == identity)."""
    h = jax.nn.relu(state @ params["w1"].T + params["b1"])
    h = jax.nn.relu(h @ params["w2"].T + params["b2"])
    h = jax.nn.relu(h @ params["w3"].T + params["b3"])
    return h @ params["w4"].T + params["b4"]


if __name__ == "__main__":
    batch = 200          # not a multiple of 128: exercises tail padding
    input_size = 10
    hidden_size = 128    # module default

    key = jax.random.PRNGKey(0)
    k_state, k_params = jax.random.split(key)

    state = jax.random.normal(k_state, (batch, input_size), dtype=jnp.float32)
    params = init_params(k_params, input_size, hidden_size)

    # batch=200 -> padded to 256 lanes, split into 2 tiles of 128 (2 grid steps).
    out = critic_forward(state, params)
    out = jax.block_until_ready(out)

    ref = _reference_forward(state, params)
    assert out.shape == (batch, 1), out.shape
    max_err = float(jnp.max(jnp.abs(out - ref)))
    # bf16 MXU inputs (+ bf16 epilogue on v6e/v7x) with f32 accumulation ->
    # loosened tolerance vs the f32 reference.
    assert max_err < 5e-2, f"max abs err {max_err}"

    print("KERNEL_OK")
</pallas_src>

<mosaic_0001>
module attributes {stable_mosaic.version = 11 : i64} {
  func.func @_critic_kernel(%arg0: i32, %arg1: memref<16x128xbf16, #tpu.memory_space<vmem>>, %arg2: memref<128x16xbf16, #tpu.memory_space<vmem>>, %arg3: memref<128x1xf32, #tpu.memory_space<vmem>>, %arg4: memref<128x128xbf16, #tpu.memory_space<vmem>>, %arg5: memref<128x1xf32, #tpu.memory_space<vmem>>, %arg6: memref<128x128xbf16, #tpu.memory_space<vmem>>, %arg7: memref<128x1xf32, #tpu.memory_space<vmem>>, %arg8: memref<8x128xbf16, #tpu.memory_space<vmem>>, %arg9: memref<1x1xf32, #tpu.memory_space<vmem>>, %arg10: memref<1x128xf32, #tpu.memory_space<vmem>>) attributes {dimension_semantics = [#tpu.dimension_semantics<parallel>], iteration_bounds = array<i64: 2>, scalar_prefetch = 0 : i64, scratch_operands = 0 : i64, tpu.core_type = #tpu.core_type<tc>, window_params = [{transform_indices = @transform_0, window_bounds = array<i64: 16, 128>}, {pipeline_mode = #tpu.pipeline_mode<synchronous>, transform_indices = @transform_1, window_bounds = array<i64: 128, 16>}, {pipeline_mode = #tpu.pipeline_mode<synchronous>, transform_indices = @transform_2, window_bounds = array<i64: 128, 1>}, {pipeline_mode = #tpu.pipeline_mode<synchronous>, transform_indices = @transform_3, window_bounds = array<i64: 128, 128>}, {pipeline_mode = #tpu.pipeline_mode<synchronous>, transform_indices = @transform_4, window_bounds = array<i64: 128, 1>}, {pipeline_mode = #tpu.pipeline_mode<synchronous>, transform_indices = @transform_5, window_bounds = array<i64: 128, 128>}, {pipeline_mode = #tpu.pipeline_mode<synchronous>, transform_indices = @transform_6, window_bounds = array<i64: 128, 1>}, {pipeline_mode = #tpu.pipeline_mode<synchronous>, transform_indices = @transform_7, window_bounds = array<i64: 8, 128>}, {pipeline_mode = #tpu.pipeline_mode<synchronous>, transform_indices = @transform_8, window_bounds = array<i64: 1, 1>}, {transform_indices = @transform_9, window_bounds = array<i64: 1, 128>}]} {
    %c0 = arith.constant 0 : index
    %c0_0 = arith.constant 0 : index
    %0 = vector.load %arg1[%c0, %c0_0] : memref<16x128xbf16, #tpu.memory_space<vmem>>, vector<16x128xbf16>
    %c0_1 = arith.constant 0 : index
    %c0_2 = arith.constant 0 : index
    %1 = vector.load %arg2[%c0_1, %c0_2] : memref<128x16xbf16, #tpu.memory_space<vmem>>, vector<128x16xbf16>
    %cst = arith.constant dense<0.000000e+00> : vector<128x128xf32>
    %2 = tpu.matmul %1, %0, %cst {dimension_numbers = #tpu.dot_dimension_numbers<[1], [0], [0], [1], [0, 0, 1, 1], [], []>} : vector<128x16xbf16>, vector<16x128xbf16>, vector<128x128xf32> -> vector<128x128xf32>
    %c0_3 = arith.constant 0 : index
    %c0_4 = arith.constant 0 : index
    %3 = vector.load %arg3[%c0_3, %c0_4] : memref<128x1xf32, #tpu.memory_space<vmem>>, vector<128x1xf32>
    %4 = vector.broadcast %3 : vector<128x1xf32> to vector<128x128xf32>
    %5 = arith.addf %2, %4 : vector<128x128xf32>
    %cst_5 = arith.constant 0.000000e+00 : f32
    %6 = vector.broadcast %cst_5 : f32 to vector<128x128xf32>
    %7 = arith.maximumf %5, %6 : vector<128x128xf32>
    %8 = arith.truncf %7 : vector<128x128xf32> to vector<128x128xbf16>
    %c0_6 = arith.constant 0 : index
    %c0_7 = arith.constant 0 : index
    %9 = vector.load %arg4[%c0_6, %c0_7] : memref<128x128xbf16, #tpu.memory_space<vmem>>, vector<128x128xbf16>
    %cst_8 = arith.constant dense<0.000000e+00> : vector<128x128xf32>
    %10 = tpu.matmul %9, %8, %cst_8 {dimension_numbers = #tpu.dot_dimension_numbers<[1], [0], [0], [1], [0, 0, 1, 1], [], []>} : vector<128x128xbf16>, vector<128x128xbf16>, vector<128x128xf32> -> vector<128x128xf32>
    %c0_9 = arith.constant 0 : index
    %c0_10 = arith.constant 0 : index
    %11 = vector.load %arg5[%c0_9, %c0_10] : memref<128x1xf32, #tpu.memory_space<vmem>>, vector<128x1xf32>
    %12 = vector.broadcast %11 : vector<128x1xf32> to vector<128x128xf32>
    %13 = arith.addf %10, %12 : vector<128x128xf32>
    %cst_11 = arith.constant 0.000000e+00 : f32
    %14 = vector.broadcast %cst_11 : f32 to vector<128x128xf32>
    %15 = arith.maximumf %13, %14 : vector<128x128xf32>
    %16 = arith.truncf %15 : vector<128x128xf32> to vector<128x128xbf16>
    %c0_12 = arith.constant 0 : index
    %c0_13 = arith.constant 0 : index
    %17 = vector.load %arg6[%c0_12, %c0_13] : memref<128x128xbf16, #tpu.memory_space<vmem>>, vector<128x128xbf16>
    %cst_14 = arith.constant dense<0.000000e+00> : vector<128x128xf32>
    %18 = tpu.matmul %17, %16, %cst_14 {dimension_numbers = #tpu.dot_dimension_numbers<[1], [0], [0], [1], [0, 0, 1, 1], [], []>} : vector<128x128xbf16>, vector<128x128xbf16>, vector<128x128xf32> -> vector<128x128xf32>
    %c0_15 = arith.constant 0 : index
    %c0_16 = arith.constant 0 : index
    %19 = vector.load %arg7[%c0_15, %c0_16] : memref<128x1xf32, #tpu.memory_space<vmem>>, vector<128x1xf32>
    %20 = vector.broadcast %19 : vector<128x1xf32> to vector<128x128xf32>
    %21 = arith.addf %18, %20 : vector<128x128xf32>
    %cst_17 = arith.constant 0.000000e+00 : f32
    %22 = vector.broadcast %cst_17 : f32 to vector<128x128xf32>
    %23 = arith.maximumf %21, %22 : vector<128x128xf32>
    %24 = arith.truncf %23 : vector<128x128xf32> to vector<128x128xbf16>
    %c0_18 = arith.constant 0 : index
    %c0_19 = arith.constant 0 : index
    %25 = vector.load %arg8[%c0_18, %c0_19] : memref<8x128xbf16, #tpu.memory_space<vmem>>, vector<8x128xbf16>
    %cst_20 = arith.constant dense<0.000000e+00> : vector<8x128xf32>
    %26 = tpu.matmul %25, %24, %cst_20 {dimension_numbers = #tpu.dot_dimension_numbers<[1], [0], [0], [1], [0, 0, 1, 1], [], []>} : vector<8x128xbf16>, vector<128x128xbf16>, vector<8x128xf32> -> vector<8x128xf32>
    %27 = vector.extract_strided_slice %26 {offsets = [0, 0], sizes = [1, 128], strides = [1, 1]} : vector<8x128xf32> to vector<1x128xf32>
    %c0_21 = arith.constant 0 : index
    %c0_22 = arith.constant 0 : index
    %28 = vector.load %arg9[%c0_21, %c0_22] : memref<1x1xf32, #tpu.memory_space<vmem>>, vector<1x1xf32>
    %29 = vector.broadcast %28 : vector<1x1xf32> to vector<1x128xf32>
    %30 = arith.addf %27, %29 : vector<1x128xf32>
    %c0_23 = arith.constant 0 : index
    %c0_24 = arith.constant 0 : index
    %31 = vector.load %arg10[%c0_23, %c0_24] : memref<1x128xf32, #tpu.memory_space<vmem>>, vector<1x128xf32>
    tpu.vector_store %arg10[%c0_23, %c0_24], %30 {strides = array<i32>} : memref<1x128xf32, #tpu.memory_space<vmem>>, vector<1x128xf32>,
    return
  }
  func.func @transform_0(%arg0: i32) -> (i32, i32) {
    %c0_i32 = arith.constant 0 : i32
    %c0_i32_0 = arith.constant 0 : i32
    return %c0_i32, %arg0 : i32, i32
  }
  func.func @transform_1(%arg0: i32) -> (i32, i32) {
    %c0_i32 = arith.constant 0 : i32
    %c0_i32_0 = arith.constant 0 : i32
    %c0_i32_1 = arith.constant 0 : i32
    return %c0_i32, %c0_i32_0 : i32, i32
  }
  func.func @transform_2(%arg0: i32) -> (i32, i32) {
    %c0_i32 = arith.constant 0 : i32
    %c0_i32_0 = arith.constant 0 : i32
    %c0_i32_1 = arith.constant 0 : i32
    return %c0_i32, %c0_i32_0 : i32, i32
  }
  func.func @transform_3(%arg0: i32) -> (i32, i32) {
    %c0_i32 = arith.constant 0 : i32
    %c0_i32_0 = arith.constant 0 : i32
    %c0_i32_1 = arith.constant 0 : i32
    return %c0_i32, %c0_i32_0 : i32, i32
  }
  func.func @transform_4(%arg0: i32) -> (i32, i32) {
    %c0_i32 = arith.constant 0 : i32
    %c0_i32_0 = arith.constant 0 : i32
    %c0_i32_1 = arith.constant 0 : i32
    return %c0_i32, %c0_i32_0 : i32, i32
  }
  func.func @transform_5(%arg0: i32) -> (i32, i32) {
    %c0_i32 = arith.constant 0 : i32
    %c0_i32_0 = arith.constant 0 : i32
    %c0_i32_1 = arith.constant 0 : i32
    return %c0_i32, %c0_i32_0 : i32, i32
  }
  func.func @transform_6(%arg0: i32) -> (i32, i32) {
    %c0_i32 = arith.constant 0 : i32
    %c0_i32_0 = arith.constant 0 : i32
    %c0_i32_1 = arith.constant 0 : i32
    return %c0_i32, %c0_i32_0 : i32, i32
  }
  func.func @transform_7(%arg0: i32) -> (i32, i32) {
    %c0_i32 = arith.constant 0 : i32
    %c0_i32_0 = arith.constant 0 : i32
    %c0_i32_1 = arith.constant 0 : i32
    return %c0_i32, %c0_i32_0 : i32, i32
  }
  func.func @transform_8(%arg0: i32) -> (i32, i32) {
    %c0_i32 = arith.constant 0 : i32
    %c0_i32_0 = arith.constant 0 : i32
    %c0_i32_1 = arith.constant 0 : i32
    return %c0_i32, %c0_i32_0 : i32, i32
  }
  func.func @transform_9(%arg0: i32) -> (i32, i32) {
    %c0_i32 = arith.constant 0 : i32
    %c0_i32_0 = arith.constant 0 : i32
    return %c0_i32, %arg0 : i32, i32
  }
}

</mosaic_0001>

<bundles_post_ra>
// kernel: critic_forward.1
= control target key start
LH: loop header
LB: loop body
LE: loop exit
PB: predicated region body
PF: predicated region fallthrough
CT: control target
= control target key end

     0   :  { %s1999_s0 = inlined_call_operand.vmem [shape: bf16[16,256], index: 0, kind: input, shape index: {}]   ;;  %s2000_s1 = inlined_call_operand.vmem [shape: bf16[128,16], index: 1, kind: input, shape index: {}]   ;;  %s2001_s2 = inlined_call_operand.vmem [shape: f32[128,1], index: 2, kind: input, shape index: {}]   ;;  %s2002_s3 = inlined_call_operand.vmem [shape: bf16[128,128], index: 3, kind: input, shape index: {}]   ;;  %s2003_s4 = inlined_call_operand.vmem [shape: f32[128,1], index: 4, kind: input, shape index: {}]   ;;  %s2004_s5 = inlined_call_operand.vmem [shape: bf16[128,128], index: 5, kind: input, shape index: {}]   ;;  %s2005_s6 = inlined_call_operand.vmem [shape: f32[128,1], index: 6, kind: input, shape index: {}]   ;;  %s2006_s7 = inlined_call_operand.vmem [shape: bf16[8,128], index: 7, kind: input, shape index: {}]   ;;  %s2007_s8 = inlined_call_operand.<no memory space> [shape: f32[1,1], index: 8, kind: input, shape index: {}]   ;;  %s2008_s9 = inlined_call_operand.vmem [shape: f32[1,256], index: 9, kind: output, shape index: {}]  }
   0x1   :  { %v14_v0 = vstv %s2007_s8 }
   0x2   :  { %15 = vst [vmem:[#allocation2] sm:$0x1] %v14_v0 }
   0x3   :  { %s1682_s11 = smov 0   ;;  %s1684_s12 = smov 0  }
   0x4   :  { %s1686_s13 = smov 0  }
   0x5 LB: > { %s1353_s8 = sadd.s32 4294967295, %s1624_s13   ;;  %s1699_s14 = sadd.s32 1, %s1624_s13   ;;  %s1624_s13 = sphi %s1686_s13, %s2011_s13   ;;  %s1620_s12 = sphi %s1684_s12, %s2010_s12   ;;  %s1616_s11 = sphi %s1682_s11, %s2009_s11  }
   0x6   : > { %s25_s15 = ssub.s32 %s1624_s13, %s1699_s14  ;;  %s28_s16 = sadd.s32 1, %s1620_s12 }
   0x7   : > { %p26_p0 = scmp.eq.s32.totalorder %s25_s15, 0  ;;  %p35_p1 = scmp.ne.s32.totalorder %s1620_s12, %s1616_s11 }
   0x8   : > { %p36_p2 = scmp.eq.s32.totalorder %s1624_s13, 0  ;;  %p1356_p4 = scmp.ge.s32.totalorder %s1624_s13, 2 }
   0x9   : > { %s1708_s17 = scalar_select %p26_p0, %s1620_s12, %s28_s16  }
   0xa   : > { %p37_p3 = por %p36_p2, %p35_p1  ;;  %279 = sbr.rel (%p1356_p4) target bundleno = 20 (0x14), region = 48 }
   0xf   : > { %282 = sbr.rel (!%p37_p3) target bundleno = 20 (0x14), region = 52  ;;  %s284_s18 = sand.u32 (%p37_p3), 1, %s1620_s12  }
  0x10   : > { %s1358_s19 = sshll.u32 (%p37_p3), %s1624_s13, 2  ;;  %s1357_s20 = sshll.u32 (%p37_p3), %s284_s18, 3 }
  0x11   : > { %s288_s23 = scalar_lea.vmem (%p37_p3), %s1999_s0, %s1358_s19  ;;  %s286_s24 = scalar_lea.vmem (%p37_p3), [#allocation3], %s1357_s20 }
  0x12   : > { %v305_v1 = vld [vmem:[%s288_s23] sm:$0xf] (%p37_p3)  ;;  %v307_v2 = vld [vmem:[%s288_s23 + $0x8] sm:$0xf] (%p37_p3) }
  0x13   : > { %306 = vst [vmem:[%s286_s24] sm:$0xf] (%p37_p3), %v305_v1  ;;  %308 = vst [vmem:[%s286_s24 + $0x4] sm:$0xf] (%p37_p3), %v307_v2 }
  0x14 PF: > { %p1359_p5 = scmp.ge.s32.totalorder %s1624_s13, 1  ;;  %p335_p6 = scmp.lt.s32.totalorder %s1624_s13, 3 }
  0x16   : > { %p336_p7 = pnand %p1359_p5, %p335_p6 }
  0x17   : > { %s342_s25 = sand.u32 (!%p336_p7), 1, %s1616_s11   ;;  %p375_p8 = scmp.lt.s32.totalorder (!%p336_p7), %s1353_s8, 1 }
  0x18   : > { %339 = sbr.rel (%p336_p7) target bundleno = 1011 (0x3f3), region = 93  ;;  %s1360_s30 = sshll.u32 (!%p336_p7), %s342_s25, 3 }
  0x19   : > { %s344_s11 = scalar_lea.vmem (!%p336_p7), [#allocation3], %s1360_s30 }
  0x1d   : > { %v411_v3 = vld [vmem:[%s2001_s2 + $0x70] sm:$0xff]  ;;  %v1578_v4 = vld [vmem:[%s2000_s1] sm:$0xff]   ;;  %v1626_v5 = vmov 0   ;;  %vm539_vm0 = vcmask 130048   ;;  %v412_v6 = vld [vmem:[%s2001_s2 + $0x78] sm:$0xff]  ;;  %vm1628_vm1 = vmmov 0  }
  0x1e   : > { %1575 = vset.pattern.permute.xlu0 %v1626_v5  ;;  %1576 = vset.pattern.permute.xlu1 %v1626_v5  ;;  %v1577_v7 = vld [vmem:[%s344_s11] sm:$0xff]   ;;  %v408_v13 = vld [vmem:[%s2001_s2 + $0x58] sm:$0xff]  ;;  %v1288_v61 = vld [vmem:[#allocation2] sm:$0x1]  ;;  %s2013_s8 = smov (!%p375_p8, %s1353_s8), 1 }
  0x1f   : > { %485 = vperm.xlu0 %1575, %v411_v3   ;;  %1448 = vmatprep.mubr.msk.bf16.mxu0 %vm539_vm0, %v1578_v4  ;;  %v409_v8 = vld [vmem:[%s2001_s2 + $0x60] sm:$0xff]  ;;  %v1579_v9 = vld [vmem:[%s2000_s1 + $0x8] sm:$0xff]   ;;  %v1580_v10 = vld [vmem:[%s2000_s1 + $0x10] sm:$0xff]   ;;  %s377_s23 = scalar_lea.vmem %s2008_s9, %s2013_s8 }
  0x20   : > { %1446 = vmatprep.subr.bf16.mxu0 %v1577_v7  ;;  %475 = vperm.xlu1 %1576, %v409_v8   ;;  %v410_v11 = vld [vmem:[%s2001_s2 + $0x68] sm:$0xff]  ;;  %v407_v12 = vld [vmem:[%s2001_s2 + $0x50] sm:$0xff]  ;;  %v405_v14 = vld [vmem:[%s2001_s2 + $0x40] sm:$0xff] }
  0x21   : > { %1447 = vmatpush3.bf16.msra.mxu0 %v1577_v7  ;;  %v1581_v15 = vld [vmem:[%s2000_s1 + $0x18] sm:$0xff]   ;;  %v1582_v16 = vld [vmem:[%s2000_s1 + $0x20] sm:$0xff]   ;;  %v406_v17 = vld [vmem:[%s2001_s2 + $0x48] sm:$0xff] }
  0x22   : > { %v403_v18 = vld [vmem:[%s2001_s2 + $0x30] sm:$0xff]  ;;  %v404_v19 = vld [vmem:[%s2001_s2 + $0x38] sm:$0xff]  ;;  %v401_v20 = vld [vmem:[%s2001_s2 + $0x20] sm:$0xff] }
  0x23   : > { %490 = vperm.xlu0 %1575, %v412_v6   ;;  %v1583_v21 = vld [vmem:[%s2000_s1 + $0x28] sm:$0xff]   ;;  %v1584_v22 = vld [vmem:[%s2000_s1 + $0x30] sm:$0xff]   ;;  %v397_v25 = vld [vmem:[%s2001_s2] sm:$0xff] }
  0x24   : > { %1449 = vmatmul.mubr.msk.bf16.vlgmr.msra.gmra.mxu0 %vm539_vm0, %v1579_v9  ;;  %480 = vperm.xlu1 %1576, %v410_v11   ;;  %v402_v23 = vld [vmem:[%s2001_s2 + $0x28] sm:$0xff]  ;;  %v399_v24 = vld [vmem:[%s2001_s2 + $0x10] sm:$0xff]  ;;  %v400_v26 = vld [vmem:[%s2001_s2 + $0x18] sm:$0xff] }
  0x25   : > { %1452 = vmatprep.mubr.msk.bf16.mxu0 %vm539_vm0, %v1580_v10  ;;  %v1585_v27 = vld [vmem:[%s2000_s1 + $0x38] sm:$0xff]   ;;  %v398_v28 = vld [vmem:[%s2001_s2 + $0x8] sm:$0xff]  ;;  %v715_v29 = vld [vmem:[%s2003_s4 + $0x70] sm:$0xff] }
  0x26   : > { %v716_v30 = vld [vmem:[%s2003_s4 + $0x78] sm:$0xff]  ;;  %v713_v31 = vld [vmem:[%s2003_s4 + $0x60] sm:$0xff]  ;;  %v714_v32 = vld [vmem:[%s2003_s4 + $0x68] sm:$0xff] }
  0x27   : > { %465 = vperm.xlu0 %1575, %v407_v12   ;;  %v711_v33 = vld [vmem:[%s2003_s4 + $0x50] sm:$0xff]  ;;  %v712_v34 = vld [vmem:[%s2003_s4 + $0x58] sm:$0xff]  ;;  %v709_v35 = vld [vmem:[%s2003_s4 + $0x40] sm:$0xff] }
  0x28   : > { %470 = vperm.xlu1 %1576, %v408_v13   ;;  %v710_v36 = vld [vmem:[%s2003_s4 + $0x48] sm:$0xff]  ;;  %v707_v37 = vld [vmem:[%s2003_s4 + $0x30] sm:$0xff]  ;;  %v708_v38 = vld [vmem:[%s2003_s4 + $0x38] sm:$0xff] }
  0x29   : > { %v705_v39 = vld [vmem:[%s2003_s4 + $0x20] sm:$0xff]  ;;  %v706_v40 = vld [vmem:[%s2003_s4 + $0x28] sm:$0xff]  ;;  %v703_v41 = vld [vmem:[%s2003_s4 + $0x10] sm:$0xff] }
  0x2a   : > { %v704_v42 = vld [vmem:[%s2003_s4 + $0x18] sm:$0xff]  ;;  %v701_v43 = vld [vmem:[%s2003_s4] sm:$0xff]  ;;  %v702_v44 = vld [vmem:[%s2003_s4 + $0x8] sm:$0xff] }
  0x2b   : > { %455 = vperm.xlu0 %1575, %v405_v14   ;;  %v996_v45 = vld [vmem:[%s2005_s6 + $0x70] sm:$0xff]  ;;  %v997_v46 = vld [vmem:[%s2005_s6 + $0x78] sm:$0xff]  ;;  %v994_v47 = vld [vmem:[%s2005_s6 + $0x60] sm:$0xff] }
  0x2c   : > { %1453 = vmatmul.mubr.msk.bf16.gmra.mxu0 %vm539_vm0, %v1581_v15  ;;  %460 = vperm.xlu1 %1576, %v406_v17   ;;  %v995_v48 = vld [vmem:[%s2005_s6 + $0x68] sm:$0xff]  ;;  %v992_v49 = vld [vmem:[%s2005_s6 + $0x50] sm:$0xff]  ;;  %v993_v50 = vld [vmem:[%s2005_s6 + $0x58] sm:$0xff] }
  0x2d   : > { %1456 = vmatprep.mubr.msk.bf16.mxu0 %vm539_vm0, %v1582_v16  ;;  %v990_v51 = vld [vmem:[%s2005_s6 + $0x40] sm:$0xff]  ;;  %v991_v52 = vld [vmem:[%s2005_s6 + $0x48] sm:$0xff]  ;;  %v988_v53 = vld [vmem:[%s2005_s6 + $0x30] sm:$0xff] }
  0x2e   : > { %v989_v54 = vld [vmem:[%s2005_s6 + $0x38] sm:$0xff]  ;;  %v986_v55 = vld [vmem:[%s2005_s6 + $0x20] sm:$0xff]  ;;  %v987_v56 = vld [vmem:[%s2005_s6 + $0x28] sm:$0xff] }
  0x2f   : > { %445 = vperm.xlu0 %1575, %v403_v18   ;;  %v984_v57 = vld [vmem:[%s2005_s6 + $0x10] sm:$0xff]  ;;  %v985_v58 = vld [vmem:[%s2005_s6 + $0x18] sm:$0xff]  ;;  %v982_v59 = vld [vmem:[%s2005_s6] sm:$0xff] }
  0x30   : > { %450 = vperm.xlu1 %1576, %v404_v19   ;;  %v983_v60 = vld [vmem:[%s2005_s6 + $0x8] sm:$0xff]  ;;  %v1586_v62 = vld [vmem:[%s2002_s3] sm:$0xff]  }
  0x31   : > { %1480 = vmatprep.mubr.bf16.mxu1 %v1586_v62 }
  0x33   : > { %435 = vperm.xlu0 %1575, %v401_v20  }
  0x34   : > { %1457 = vmatmul.mubr.msk.bf16.gmra.mxu0 %vm539_vm0, %v1583_v21  ;;  %440 = vperm.xlu1 %1576, %v402_v23  }
  0x35   : > { %1460 = vmatprep.mubr.msk.bf16.mxu0 %vm539_vm0, %v1584_v22 }
  0x37   : > { %425 = vperm.xlu0 %1575, %v399_v24  }
  0x38   : > { %430 = vperm.xlu1 %1576, %v400_v26  }
  0x3b   : > { %415 = vperm.xlu0 %1575, %v397_v25  }
  0x3c   : > { %1461 = vmatmul.mubr.msk.bf16.gmra.mxu0 %vm539_vm0, %v1585_v27  ;;  %420 = vperm.xlu1 %1576, %v398_v28  }
  0x3f   : > { %789 = vperm.xlu0 %1575, %v715_v29  }
  0x40   : > { %794 = vperm.xlu1 %1576, %v716_v30  }
  0x43   : > { %779 = vperm.xlu0 %1575, %v713_v31  }
  0x44   : > { %784 = vperm.xlu1 %1576, %v714_v32  }
  0x47   : > { %769 = vperm.xlu0 %1575, %v711_v33  }
  0x48   : > { %774 = vperm.xlu1 %1576, %v712_v34  }
  0x4b   : > { %759 = vperm.xlu0 %1575, %v709_v35  }
  0x4c   : > { %764 = vperm.xlu1 %1576, %v710_v36  }
  0x4f   : > { %749 = vperm.xlu0 %1575, %v707_v37  }
  0x50   : > { %754 = vperm.xlu1 %1576, %v708_v38  }
  0x53   : > { %739 = vperm.xlu0 %1575, %v705_v39  }
  0x54   : > { %744 = vperm.xlu1 %1576, %v706_v40  }
  0x57   : > { %729 = vperm.xlu0 %1575, %v703_v41  }
  0x58   : > { %734 = vperm.xlu1 %1576, %v704_v42  }
  0x5b   : > { %719 = vperm.xlu0 %1575, %v701_v43  }
  0x5c   : > { %724 = vperm.xlu1 %1576, %v702_v44  }
  0x5f   : > { %1070 = vperm.xlu0 %1575, %v996_v45  }
  0x60   : > { %1075 = vperm.xlu1 %1576, %v997_v46  }
  0x63   : > { %1060 = vperm.xlu0 %1575, %v994_v47  }
  0x64   : > { %1065 = vperm.xlu1 %1576, %v995_v48  }
  0x67   : > { %1050 = vperm.xlu0 %1575, %v992_v49  }
  0x68   : > { %1055 = vperm.xlu1 %1576, %v993_v50  }
  0x6b   : > { %1040 = vperm.xlu0 %1575, %v990_v51  }
  0x6c   : > { %1045 = vperm.xlu1 %1576, %v991_v52  }
  0x6f   : > { %1030 = vperm.xlu0 %1575, %v988_v53  }
  0x70   : > { %1035 = vperm.xlu1 %1576, %v989_v54  }
  0x73   : > { %1020 = vperm.xlu0 %1575, %v986_v55  }
  0x74   : > { %1025 = vperm.xlu1 %1576, %v987_v56  }
  0x77   : > { %1010 = vperm.xlu0 %1575, %v984_v57  }
  0x78   : > { %1015 = vperm.xlu1 %1576, %v985_v58  }
  0x7b   : > { %1000 = vperm.xlu0 %1575, %v982_v59  }
  0x7c   : > { %1005 = vperm.xlu1 %1576, %v983_v60  }
  0x7f   : > { %1291 = vperm.xlu0 %1575, %v1288_v61  }
  0x9a   : > { %v486_v5 = vpop.permute.xlu0 %485 }
  0x9b   : > { %v476_v3 = vpop.permute.xlu1 %475 }
  0x9e   : > { %v491_v10 = vpop.permute.xlu0 %490 }
  0x9f   : > { %v481_v8 = vpop.permute.xlu1 %480 }
  0xa2   : > { %v466_v15 = vpop.permute.xlu0 %465 }
  0xa3   : > { %v471_v13 = vpop.permute.xlu1 %470 }
  0xa6   : > { %v456_v21 = vpop.permute.xlu0 %455 }
  0xa7   : > { %v461_v18 = vpop.permute.xlu1 %460 }
  0xaa   : > { %v446_v35 = vpop.permute.xlu0 %445 }
  0xab   : > { %v451_v30 = vpop.permute.xlu1 %450 }
  0xae   : > { %v436_v45 = vpop.permute.xlu0 %435 }
  0xaf   : > { %v441_v41 = vpop.permute.xlu1 %440 }
  0xb2   : > { %v426_v54 = vpop.permute.xlu0 %425 }
  0xb3   : > { %v431_v51 = vpop.permute.xlu1 %430 }
  0xb7   : > { %v421_v60 = vpop.permute.xlu1 %420 }
  0xe4   : > { %v1898_v63 = vpop.f32.mrf.mxu0 }
  0xe5   : > { %v607_v58 = vadd.f32 %v1898_v63, %v426_v54  ;;  %v1587_v63 = vld [vmem:[%s2002_s3 + $0x8] sm:$0xff]  }
  0xe6   : > { %v1900_v0 = vpop.f32.mrf.mxu0 }
  0xe8   : > { %v1451_v1 = vpop.f32.mrf.mxu0 }
  0xe9   : > { %v610_v55 = vadd.f32 %v1451_v1, %v431_v51 }
  0xea   : > { %v1902_v2 = vpop.f32.mrf.mxu0 }
  0xeb   : > { %v664_v61 = vmax.f32 %v610_v55, 0.0  ;;  %v602_v62 = vadd.f32 %v1902_v2, %v421_v60  ;;  %v1588_v2 = vld [vmem:[%s2002_s3 + $0x10] sm:$0xff]  }
  0xec   : > { %v1454_v4 = vpop.f32.mrf.mxu0 }
  0xed   : > { %v623_v46 = vadd.f32 %v1454_v4, %v446_v35  ;;  %v416_v4 = vpop.permute.xlu0 %415  ;;  %v662_v1 = vmax.f32 %v602_v62, 0.0 }
  0xee   : > { %v614_v6 = vpop.f32.mrf.mxu0 }
  0xef   : > { %v667_v52 = vmax.f32 %v623_v46, 0.0  ;;  %v615_v53 = vadd.f32 %v614_v6, %v436_v45  ;;  %v599_v6 = vadd.f32 %v1900_v0, %v416_v4  ;;  %v1589_v0 = vld [vmem:[%s2002_s3 + $0x18] sm:$0xff]  }
  0xf0   : > { %v1455_v7 = vpop.f32.mrf.mxu0 }
  0xf1   : > { %v626_v42 = vadd.f32 %v1455_v7, %v451_v30  ;;  %v665_v59 = vmax.f32 %v615_v53, 0.0 }
  0xf2   : > { %v617_v9 = vpop.f32.mrf.mxu0 }
  0xf3   : > { %v668_v48 = vmax.f32 %v626_v42, 0.0  ;;  %v618_v49 = vadd.f32 %v617_v9, %v441_v41 }
  0xf4   : > { %v1458_v11 = vpop.f32.mrf.mxu0 }
  0xf5   : > { %v639_v31 = vadd.f32 %v1458_v11, %v466_v15  ;;  %v680_v56 = vpack.c.bf16 %v668_v48, %v667_v52  ;;  %v666_v57 = vmax.f32 %v618_v49, 0.0  ;;  %v1591_v11 = vld [vmem:[%s2002_s3 + $0x28] sm:$0xff]  }
  0xf6   : > { %v630_v12 = vpop.f32.mrf.mxu0 }
  0xf7   : > { %v671_v39 = vmax.f32 %v639_v31, 0.0  ;;  %v631_v40 = vadd.f32 %v630_v12, %v456_v21  ;;  %v1592_v12 = vld [vmem:[%s2002_s3 + $0x30] sm:$0xff]   ;;  %v790_v21 = vpop.permute.xlu0 %789 }
  0xf8   : > { %v1459_v14 = vpop.f32.mrf.mxu0 }
  0xf9   : > { %v642_v26 = vadd.f32 %v1459_v14, %v471_v13  ;;  %v669_v47 = vmax.f32 %v631_v40, 0.0  ;;  %v1593_v13 = vld [vmem:[%s2002_s3 + $0x38] sm:$0xff]   ;;  %v1594_v14 = vld [vmem:[%s2004_s5] sm:$0xff]  }
  0xfa   : > { %v633_v16 = vpop.f32.mrf.mxu0  ;;  %1512 = vmatprep.mubr.bf16.mxu0 %v1594_v14 }
  0xfb   : > { %v672_v36 = vmax.f32 %v642_v26, 0.0  ;;  %v634_v37 = vadd.f32 %v633_v16, %v461_v18  ;;  %v780_v26 = vpop.permute.xlu0 %779 }
  0xfc   : > { %v1462_v17 = vpop.f32.mrf.mxu0 }
  0xfd   : > { %v655_v20 = vadd.f32 %v1462_v17, %v486_v5  ;;  %v682_v43 = vpack.c.bf16 %v672_v36, %v671_v39  ;;  %v670_v44 = vmax.f32 %v634_v37, 0.0  ;;  %v663_v5 = vmax.f32 %v607_v58, 0.0 }
  0xfe   : > { %v646_v19 = vpop.f32.mrf.mxu0 }
  0xff   : > { %v647_v23 = vadd.f32 %v646_v19, %v476_v3  ;;  %v675_v27 = vmax.f32 %v655_v20, 0.0  ;;  %v681_v50 = vpack.c.bf16 %v670_v44, %v669_v47  ;;  %v679_v3 = vpack.c.bf16 %v666_v57, %v665_v59  ;;  %v795_v19 = vpop.permute.xlu1 %794  ;;  %v770_v31 = vpop.permute.xlu0 %769 }
 0x100   : > { %v1463_v22 = vpop.f32.mrf.mxu0  ;;  %v678_v7 = vpack.c.bf16 %v664_v61, %v663_v5 }
 0x101   : > { %v658_v24 = vadd.f32 %v1463_v22, %v491_v10  ;;  %v673_v32 = vmax.f32 %v647_v23, 0.0  ;;  %v1590_v10 = vld [vmem:[%s2002_s3 + $0x20] sm:$0xff]  }
 0x102   : > { %v649_v25 = vpop.f32.mrf.mxu0 }
 0x103   : > { %v676_v28 = vmax.f32 %v658_v24, 0.0  ;;  %v650_v29 = vadd.f32 %v649_v25, %v481_v8  ;;  %v661_v8 = vmax.f32 %v599_v6, 0.0  ;;  %v785_v24 = vpop.permute.xlu1 %784  ;;  %v760_v37 = vpop.permute.xlu0 %759 }
 0x105   : > { %v674_v33 = vmax.f32 %v650_v29, 0.0  ;;  %v684_v34 = vpack.c.bf16 %v676_v28, %v675_v27  ;;  %v677_v9 = vpack.c.bf16 %v662_v1, %v661_v8 }
 0x107   : > { %v683_v38 = vpack.c.bf16 %v674_v33, %v673_v32  ;;  %1464 = vmatprep.subr.bf16.mxu1 %v684_v34  ;;  %v775_v29 = vpop.permute.xlu1 %774  ;;  %v750_v51 = vpop.permute.xlu0 %749 }
 0x108   : > { %1465 = vmatpush3.bf16.msra.mxu1 %v684_v34 }
 0x109   : > { %1466 = vmatprep.subr.bf16.mxu1 %v683_v38 }
 0x10b   : > { %v765_v34 = vpop.permute.xlu1 %764  ;;  %v740_v61 = vpop.permute.xlu0 %739 }
 0x10c   : > { %1467 = vmatpush3.bf16.msra.mxu1 %v683_v38 }
 0x10d   : > { %1468 = vmatprep.subr.bf16.mxu1 %v682_v43 }
 0x10f   : > { %v755_v46 = vpop.permute.xlu1 %754 }
 0x110   : > { %1469 = vmatpush3.bf16.msra.mxu1 %v682_v43 }
 0x111   : > { %1470 = vmatprep.subr.bf16.mxu1 %v681_v50 }
 0x113   : > { %v745_v57 = vpop.permute.xlu1 %744 }
 0x114   : > { %1471 = vmatpush3.bf16.msra.mxu1 %v681_v50 }
 0x115   : > { %1472 = vmatprep.subr.bf16.mxu1 %v680_v56 }
 0x118   : > { %1473 = vmatpush3.bf16.msra.mxu1 %v680_v56 }
 0x119   : > { %1474 = vmatprep.subr.bf16.mxu1 %v679_v3 }
 0x11c   : > { %1475 = vmatpush3.bf16.msra.mxu1 %v679_v3 }
 0x11d   : > { %1476 = vmatprep.subr.bf16.mxu1 %v678_v7 }
 0x120   : > { %1477 = vmatpush3.bf16.msra.mxu1 %v678_v7  ;;  %v735_v7 = vpop.permute.xlu1 %734 }
 0x121   : > { %1478 = vmatprep.subr.bf16.mxu1 %v677_v9 }
 0x124   : > { %1479 = vmatpush3.bf16.msra.mxu1 %v677_v9  ;;  %v730_v9 = vpop.permute.xlu0 %729 }
 0x127   : > { %1481 = vmatmul.mubr.bf16.vlgmr.msra.gmra.mxu1 %v1587_v63 }
 0x128   : > { %1484 = vmatprep.mubr.bf16.mxu1 %v1588_v2 }
 0x12f   : > { %1485 = vmatmul.mubr.bf16.gmra.mxu1 %v1589_v0 }
 0x130   : > { %1488 = vmatprep.mubr.bf16.mxu1 %v1590_v10 }
 0x137   : > { %1489 = vmatmul.mubr.bf16.gmra.mxu1 %v1591_v11 }
 0x138   : > { %1492 = vmatprep.mubr.bf16.mxu1 %v1592_v12  ;;  %v725_v12 = vpop.permute.xlu1 %724 }
 0x13f   : > { %1493 = vmatmul.mubr.bf16.gmra.mxu1 %v1593_v13 }
 0x1e7   : > { %v1931_v15 = vpop.f32.mrf.mxu1 }
 0x1e8   : > { %v888_v10 = vadd.f32 %v1931_v15, %v730_v9  ;;  %v1595_v15 = vld [vmem:[%s2004_s5 + $0x8] sm:$0xff]  }
 0x1e9   : > { %v1933_v16 = vpop.f32.mrf.mxu1 }
 0x1eb   : > { %v1483_v17 = vpop.f32.mrf.mxu1 }
 0x1ec   : > { %v891_v63 = vadd.f32 %v1483_v17, %v735_v7 }
 0x1ed   : > { %v1935_v18 = vpop.f32.mrf.mxu1 }
 0x1ee   : > { %v945_v13 = vmax.f32 %v891_v63, 0.0  ;;  %v883_v14 = vadd.f32 %v1935_v18, %v725_v12  ;;  %v1596_v18 = vld [vmem:[%s2004_s5 + $0x10] sm:$0xff]  }
 0x1ef   : > { %v1486_v20 = vpop.f32.mrf.mxu1 }
 0x1f0   : > { %v904_v62 = vadd.f32 %v1486_v20, %v750_v51  ;;  %v720_v20 = vpop.permute.xlu0 %719  ;;  %v943_v17 = vmax.f32 %v883_v14, 0.0 }
 0x1f1   : > { %v895_v22 = vpop.f32.mrf.mxu1 }
 0x1f2   : > { %v948_v1 = vmax.f32 %v904_v62, 0.0  ;;  %v896_v8 = vadd.f32 %v895_v22, %v740_v61  ;;  %v880_v22 = vadd.f32 %v1933_v16, %v720_v20  ;;  %v1597_v16 = vld [vmem:[%s2004_s5 + $0x18] sm:$0xff]  }
 0x1f3   : > { %v1487_v23 = vpop.f32.mrf.mxu1 }
 0x1f4   : > { %v907_v58 = vadd.f32 %v1487_v23, %v755_v46  ;;  %v946_v11 = vmax.f32 %v896_v8, 0.0 }
 0x1f5   : > { %v898_v25 = vpop.f32.mrf.mxu1 }
 0x1f6   : > { %v949_v4 = vmax.f32 %v907_v58, 0.0  ;;  %v899_v5 = vadd.f32 %v898_v25, %v745_v57 }
 0x1f7   : > { %v1490_v27 = vpop.f32.mrf.mxu1 }
 0x1f8   : > { %v920_v47 = vadd.f32 %v1490_v27, %v770_v31  ;;  %v961_v2 = vpack.c.bf16 %v949_v4, %v948_v1  ;;  %v947_v0 = vmax.f32 %v899_v5, 0.0  ;;  %v1599_v27 = vld [vmem:[%s2004_s5 + $0x28] sm:$0xff]  }
 0x1f9   : > { %v911_v28 = vpop.f32.mrf.mxu1 }
 0x1fa   : > { %v952_v55 = vmax.f32 %v920_v47, 0.0  ;;  %v912_v56 = vadd.f32 %v911_v28, %v760_v37  ;;  %v1600_v28 = vld [vmem:[%s2004_s5 + $0x30] sm:$0xff]  }
 0x1fb   : > { %v1491_v30 = vpop.f32.mrf.mxu1 }
 0x1fc   : > { %v923_v42 = vadd.f32 %v1491_v30, %v775_v29  ;;  %v950_v3 = vmax.f32 %v912_v56, 0.0  ;;  %v1601_v29 = vld [vmem:[%s2004_s5 + $0x38] sm:$0xff]   ;;  %v1627_v30 = vmov 0.0  }
 0x1fd   : > { %v914_v32 = vpop.f32.mrf.mxu1  ;;  %1528 = vmatprep.subr.bf16.mxu1 %v1627_v30  ;;  %1544 = vmatprep.mubr.msk.bf16.mxu1 %vm1628_vm1, %v1627_v30 }
 0x1fe   : > { %v953_v52 = vmax.f32 %v923_v42, 0.0  ;;  %v915_v53 = vadd.f32 %v914_v32, %v765_v34 }
 0x1ff   : > { %v1494_v33 = vpop.f32.mrf.mxu1 }
 0x200   : > { %v936_v36 = vadd.f32 %v1494_v33, %v790_v21  ;;  %v963_v59 = vpack.c.bf16 %v953_v52, %v952_v55  ;;  %v951_v60 = vmax.f32 %v915_v53, 0.0  ;;  %v944_v21 = vmax.f32 %v888_v10, 0.0 }
 0x201   : > { %v927_v35 = vpop.f32.mrf.mxu1 }
 0x202   : > { %v928_v39 = vadd.f32 %v927_v35, %v780_v26  ;;  %v956_v43 = vmax.f32 %v936_v36, 0.0  ;;  %v962_v6 = vpack.c.bf16 %v951_v60, %v950_v3  ;;  %v959_v23 = vpack.c.bf16 %v945_v13, %v944_v21  ;;  %v1598_v26 = vld [vmem:[%s2004_s5 + $0x20] sm:$0xff]   ;;  %v1076_v36 = vpop.permute.xlu1 %1075 }
 0x203   : > { %v1495_v38 = vpop.f32.mrf.mxu1 }
 0x204   : > { %v939_v40 = vadd.f32 %v1495_v38, %v795_v19  ;;  %v954_v48 = vmax.f32 %v928_v39, 0.0  ;;  %v960_v19 = vpack.c.bf16 %v947_v0, %v946_v11  ;;  %v1071_v38 = vpop.permute.xlu0 %1070 }
 0x205   : > { %v930_v41 = vpop.f32.mrf.mxu1 }
 0x206   : > { %v957_v44 = vmax.f32 %v939_v40, 0.0  ;;  %v931_v45 = vadd.f32 %v930_v41, %v785_v24  ;;  %v942_v24 = vmax.f32 %v880_v22, 0.0  ;;  %v1066_v41 = vpop.permute.xlu1 %1065 }
 0x208   : > { %v965_v49 = vpack.c.bf16 %v957_v44, %v956_v43  ;;  %v955_v50 = vmax.f32 %v931_v45, 0.0  ;;  %v958_v25 = vpack.c.bf16 %v943_v17, %v942_v24  ;;  %v1061_v43 = vpop.permute.xlu0 %1060 }
 0x20a   : > { %v964_v54 = vpack.c.bf16 %v955_v50, %v954_v48  ;;  %1496 = vmatprep.subr.bf16.mxu0 %v965_v49  ;;  %v1056_v46 = vpop.permute.xlu1 %1055 }
 0x20b   : > { %1497 = vmatpush3.bf16.msra.mxu0 %v965_v49 }
 0x20c   : > { %1498 = vmatprep.subr.bf16.mxu0 %v964_v54  ;;  %v1051_v48 = vpop.permute.xlu0 %1050 }
 0x20e   : > { %v1046_v52 = vpop.permute.xlu1 %1045 }
 0x20f   : > { %1499 = vmatpush3.bf16.msra.mxu0 %v964_v54 }
 0x210   : > { %1500 = vmatprep.subr.bf16.mxu0 %v963_v59  ;;  %v1041_v55 = vpop.permute.xlu0 %1040 }
 0x212   : > { %v1036_v4 = vpop.permute.xlu1 %1035 }
 0x213   : > { %1501 = vmatpush3.bf16.msra.mxu0 %v963_v59 }
 0x214   : > { %1502 = vmatprep.subr.bf16.mxu0 %v962_v6  ;;  %v1031_v7 = vpop.permute.xlu0 %1030 }
 0x216   : > { %v1026_v0 = vpop.permute.xlu1 %1025 }
 0x217   : > { %1503 = vmatpush3.bf16.msra.mxu0 %v962_v6 }
 0x218   : > { %1504 = vmatprep.subr.bf16.mxu0 %v961_v2  ;;  %v1021_v13 = vpop.permute.xlu0 %1020 }
 0x21b   : > { %1505 = vmatpush3.bf16.msra.mxu0 %v961_v2 }
 0x21c   : > { %1506 = vmatprep.subr.bf16.mxu0 %v960_v19 }
 0x21f   : > { %1507 = vmatpush3.bf16.msra.mxu0 %v960_v19 }
 0x220   : > { %1508 = vmatprep.subr.bf16.mxu0 %v959_v23 }
 0x223   : > { %1509 = vmatpush3.bf16.msra.mxu0 %v959_v23  ;;  %v1016_v23 = vpop.permute.xlu1 %1015 }
 0x224   : > { %1510 = vmatprep.subr.bf16.mxu0 %v958_v25 }
 0x227   : > { %1511 = vmatpush3.bf16.msra.mxu0 %v958_v25  ;;  %v1011_v25 = vpop.permute.xlu0 %1010 }
 0x22a   : > { %1513 = vmatmul.mubr.bf16.vlgmr.msra.gmra.mxu0 %v1595_v15 }
 0x22b   : > { %1516 = vmatprep.mubr.bf16.mxu0 %v1596_v18 }
 0x232   : > { %1517 = vmatmul.mubr.bf16.gmra.mxu0 %v1597_v16 }
 0x233   : > { %1520 = vmatprep.mubr.bf16.mxu0 %v1598_v26 }
 0x23a   : > { %1521 = vmatmul.mubr.bf16.gmra.mxu0 %v1599_v27 }
 0x23b   : > { %1524 = vmatprep.mubr.bf16.mxu0 %v1600_v28  ;;  %v1006_v28 = vpop.permute.xlu1 %1005 }
 0x242   : > { %1525 = vmatmul.mubr.bf16.gmra.mxu0 %v1601_v29 }
 0x2ea   : > { %v1963_v31 = vpop.f32.mrf.mxu0 }
 0x2eb   : > { %v1169_v26 = vadd.f32 %v1963_v31, %v1011_v25 }
 0x2ec   : > { %v1965_v32 = vpop.f32.mrf.mxu0 }
 0x2ee   : > { %v1515_v33 = vpop.f32.mrf.mxu0 }
 0x2ef   : > { %v1172_v15 = vadd.f32 %v1515_v33, %v1016_v23 }
 0x2f0   : > { %v1967_v34 = vpop.f32.mrf.mxu0 }
 0x2f1   : > { %v1226_v29 = vmax.f32 %v1172_v15, 0.0 }
 0x2f2   : > { %v1518_v35 = vpop.f32.mrf.mxu0 }
 0x2f3   : > { %v1185_v14 = vadd.f32 %v1518_v35, %v1031_v7  ;;  %v1164_v35 = vadd.f32 %v1967_v34, %v1006_v28  ;;  %v1247_v34 = vld [vmem:[%s2006_s7] sm:$0xf] }
 0x2f4   : > { %v1176_v37 = vpop.f32.mrf.mxu0 }
 0x2f5   : > { %v1229_v17 = vmax.f32 %v1185_v14, 0.0  ;;  %v1177_v24 = vadd.f32 %v1176_v37, %v1021_v13  ;;  %v1225_v37 = vmax.f32 %v1169_v26, 0.0  ;;  %v1224_v31 = vmax.f32 %v1164_v35, 0.0 }
 0x2f6   : > { %v1519_v39 = vpop.f32.mrf.mxu0 }
 0x2f7   : > { %v1188_v10 = vadd.f32 %v1519_v39, %v1036_v4  ;;  %v1227_v27 = vmax.f32 %v1177_v24, 0.0  ;;  %v1240_v33 = vpack.c.bf16 %v1226_v29, %v1225_v37 }
 0x2f8   : > { %v1179_v40 = vpop.f32.mrf.mxu0 }
 0x2f9   : > { %v1230_v20 = vmax.f32 %v1188_v10, 0.0  ;;  %v1180_v21 = vadd.f32 %v1179_v40, %v1026_v0 }
 0x2fa   : > { %v1522_v42 = vpop.f32.mrf.mxu0 }
 0x2fb   : > { %v1201_v5 = vadd.f32 %v1522_v42, %v1051_v48  ;;  %v1242_v18 = vpack.c.bf16 %v1230_v20, %v1229_v17  ;;  %v1228_v16 = vmax.f32 %v1180_v21, 0.0  ;;  %v1294_v42 = vlaneseq }
 0x2fc   : > { %v1192_v44 = vpop.f32.mrf.mxu0 }
 0x2fd   : > { %v1233_v63 = vmax.f32 %v1201_v5, 0.0  ;;  %v1193_v2 = vadd.f32 %v1192_v44, %v1041_v55 }
 0x2fe   : > { %v1523_v45 = vpop.f32.mrf.mxu0 }
 0x2ff   : > { %v1204_v61 = vadd.f32 %v1523_v45, %v1056_v46  ;;  %v1231_v19 = vmax.f32 %v1193_v2, 0.0 }
 0x300   : > { %v1195_v47 = vpop.f32.mrf.mxu0 }
 0x301   : > { %v1234_v1 = vmax.f32 %v1204_v61, 0.0  ;;  %v1196_v8 = vadd.f32 %v1195_v47, %v1046_v52 }
 0x302   : > { %v1526_v49 = vpop.f32.mrf.mxu0 }
 0x303   : > { %v1217_v51 = vadd.f32 %v1526_v49, %v1071_v38  ;;  %v1244_v11 = vpack.c.bf16 %v1234_v1, %v1233_v63  ;;  %v1232_v12 = vmax.f32 %v1196_v8, 0.0  ;;  %v1001_v38 = vpop.permute.xlu0 %1000 }
 0x304   : > { %v1208_v50 = vpop.f32.mrf.mxu0  ;;  %v1161_v39 = vadd.f32 %v1965_v32, %v1001_v38 }
 0x305   : > { %v1237_v57 = vmax.f32 %v1217_v51, 0.0  ;;  %v1209_v58 = vadd.f32 %v1208_v50, %v1061_v43  ;;  %v1243_v22 = vpack.c.bf16 %v1232_v12, %v1231_v19  ;;  %v1295_v43 = vshrl.u32 %v1294_v42, 7 }
 0x306   : > { %v1527_v53 = vpop.f32.mrf.mxu0  ;;  %v1223_v40 = vmax.f32 %v1161_v39, 0.0 }
 0x307   : > { %v1220_v54 = vadd.f32 %v1527_v53, %v1076_v36  ;;  %v1235_v6 = vmax.f32 %v1209_v58, 0.0  ;;  %v1241_v36 = vpack.c.bf16 %v1228_v16, %v1227_v27  ;;  %v1296_v32 = vsub.s32 0, %v1295_v43  ;;  %v1292_v44 = vpop.permute.xlu0 %1291 }
 0x308   : > { %v1211_v56 = vpop.f32.mrf.mxu0 }
 0x309   : > { %v1238_v59 = vmax.f32 %v1220_v54, 0.0  ;;  %v1212_v60 = vadd.f32 %v1211_v56, %v1066_v41  ;;  %v1239_v41 = vpack.c.bf16 %v1224_v31, %v1223_v40  ;;  %v1297_v45 = vrot.slane %v1292_v44, %v1296_v32 }
 0x30b   : > { %v1246_v62 = vpack.c.bf16 %v1238_v59, %v1237_v57  ;;  %v1236_v3 = vmax.f32 %v1212_v60, 0.0 }
 0x30d   : > { %1529 = vmatpush3.bf16.msra.mxu1 %v1246_v62  ;;  %v1245_v9 = vpack.c.bf16 %v1236_v3, %v1235_v6 }
 0x30e   : > { %1530 = vmatprep.subr.bf16.mxu1 %v1627_v30 }
 0x311   : > { %1531 = vmatpush3.bf16.msra.mxu1 %v1245_v9 }
 0x312   : > { %1532 = vmatprep.subr.bf16.mxu1 %v1627_v30 }
 0x315   : > { %1533 = vmatpush3.bf16.msra.mxu1 %v1244_v11 }
 0x316   : > { %1534 = vmatprep.subr.bf16.mxu1 %v1627_v30 }
 0x319   : > { %1535 = vmatpush3.bf16.msra.mxu1 %v1243_v22 }
 0x31a   : > { %1536 = vmatprep.subr.bf16.mxu1 %v1627_v30 }
 0x31d   : > { %1537 = vmatpush3.bf16.msra.mxu1 %v1242_v18 }
 0x31e   : > { %1538 = vmatprep.subr.bf16.mxu1 %v1627_v30 }
 0x321   : > { %1539 = vmatpush3.bf16.msra.mxu1 %v1241_v36 }
 0x322   : > { %1540 = vmatprep.subr.bf16.mxu1 %v1627_v30 }
 0x325   : > { %1541 = vmatpush3.bf16.msra.mxu1 %v1240_v33 }
 0x326   : > { %1542 = vmatprep.subr.bf16.mxu1 %v1627_v30 }
 0x329   : > { %1543 = vmatpush3.bf16.msra.mxu1 %v1239_v41 }
 0x32c   : > { %1545 = vmatmul.mubr.bf16.vlgmr.msra.gmra.mxu1 %v1247_v34 }
 0x3ec   : > { %v1282_v30 = vpop.f32.mrf.mxu1 }
 0x3ed   : > { %v1298_v46 = vadd.f32 %v1297_v45, %v1282_v30 }
 0x3ee   : > { %v1546_v47 = vpop.f32.mrf.mxu1 }
 0x3ef   : > { %1299 = vst [vmem:[%s377_s23] sm:$0x1] %v1298_v46 }
 0x3f0   : > { %v1285_v48 = vpop.f32.mrf.mxu1 }
 0x3f2   : > { %v1547_v49 = vpop.f32.mrf.mxu1 }
 0x3f3 PF: > { %p18_p9 = scmp.ge.s32.totalorder %s1699_s14, 4   ;;  %s2009_s11 = smov %s1620_s12 }
 0x3f4   : > { %s2010_s12 = smov %s1708_s17  ;;  %s2011_s13 = smov %s1699_s14 }
 0x3f5   :  { %20 = sbr.rel (!%p18_p9) target bundleno = 5 (0x5), region = 132 }

</bundles_post_ra>
